<compile_context>
chip_gen: v6e
topology: v6e:2x2x1
jax: 0.10.0
libtpu: 0.0.40
codegen_flags: <defaults>
</compile_context>

<pallas_src>
import functools

import jax
import jax.numpy as jnp
from jax import lax
from jax.experimental import pallas as pl
from jax.experimental.pallas import tpu as pltpu


_DMA_DEPTH = 16                           # rolling window of in-flight row DMAs
_VMEM_LIMIT_BYTES = 32 * 1024 * 1024      # explicit scoped-VMEM limit (safe v5e..v7x)
_BLOCK_BUDGET_BYTES = 24 * 1024 * 1024    # budget for double-buffered blocks
_SLAB_KEEP_RATIO_THRESHOLD = 0.25         # below this, HBM row-DMA gather wins


# ----------------------------------------------------------------------------
# Variant 1: full-slab copy + in-VMEM row selection (keep ratio >= ~25%).
# ----------------------------------------------------------------------------
def _slab_gather_kernel(idx_ref, x_ref, o_ref, *, bt, num_keep):
    """In-VMEM row gather over a fully-pipelined (bt, N, D) input slab.

    idx_ref: SMEM (B*num_keep,) int32 -- scalar-prefetched flat keep indices
    x_ref:   VMEM (bt, N, D)          -- auto-pipelined input slab
    o_ref:   VMEM (bt, num_keep, D)   -- gathered (kept) patches
    """
    base = pl.program_id(0) * bt * num_keep
    for bb in range(bt):  # static: leading index stays static, pure vld/vst work
        def _copy_row(j, c, bb=bb):
            row = idx_ref[base + bb * num_keep + j]
            o_ref[bb, pl.ds(j, 1), :] = x_ref[bb, pl.ds(row, 1), :]
            return c

        lax.fori_loop(0, num_keep, _copy_row, 0, unroll=True)


# ----------------------------------------------------------------------------
# Variant 2: per-row HBM DMA gather (keep ratio < ~25%).
# ----------------------------------------------------------------------------
def _dma_gather_kernel(idx_ref, x_hbm, o_ref, sems, *, bt, num_keep):
    """DMA-gather the kept patch rows for `bt` batch elements.

    idx_ref: SMEM (B*num_keep,) int32 -- scalar-prefetched flat keep indices
    x_hbm:   ANY/HBM (B, N, D)        -- never copied wholesale into VMEM
    o_ref:   VMEM (bt, num_keep, D)   -- output block (written only by DMA)
    sems:    DMA sems (_DMA_DEPTH,)   -- rolling window of in-flight row copies
    """
    g = pl.program_id(0)
    total = bt * num_keep                    # static
    depth = min(_DMA_DEPTH, total)           # static
    base = g * total

    def _start(bb, j, slot):
        row = idx_ref[base + bb * num_keep + j]
        pltpu.make_async_copy(
            x_hbm.at[g * bt + bb, pl.ds(row, 1), :],   # (1, D) HBM row
            o_ref.at[bb, pl.ds(j, 1), :],              # (1, D) output row
            sems.at[slot],
        ).start()

    def _wait(slot):
        # Dummy descriptor: every copy on a slot is the identical (1, D)
        # shape/dtype, so only the semaphore + transfer size matter here.
        # (Fragile if copy sizes ever diverge per slot — keep them uniform.)
        pltpu.make_async_copy(
            x_hbm.at[0, pl.ds(0, 1), :], o_ref.at[0, pl.ds(0, 1), :], sems.at[slot]
        ).wait()

    # bb is a static Python index, and the prologue/steady-state boundary is
    # computed statically per bb, so the hot loop carries no branch.
    for bb in range(bt):
        lo = bb * num_keep                            # static flat offset
        n_pro = max(0, min(num_keep, depth - lo))     # rows still in prologue

        def _prologue(j, c, bb=bb, lo=lo):
            _start(bb, j, lo + j)                     # flat index < depth
            return c

        def _steady(j, c, bb=bb, lo=lo):
            # Read the SMEM index *before* the semaphore wait (the wait breaks
            # sst->sld forwarding and would stall this scalar load).
            row = idx_ref[base + lo + j]
            slot = (lo + j) % depth
            _wait(slot)                               # retire copy (flat - depth)
            pltpu.make_async_copy(
                x_hbm.at[g * bt + bb, pl.ds(row, 1), :],
                o_ref.at[bb, pl.ds(j, 1), :],
                sems.at[slot],
            ).start()
            return c

        lax.fori_loop(0, n_pro, _prologue, 0, unroll=True)
        lax.fori_loop(n_pro, num_keep, _steady, 0, unroll=True)

    # Drain the last `depth` outstanding copies before pipeline writeback.
    def _drain(t, c):
        _wait(t % depth)
        return c

    lax.fori_loop(total - depth, total, _drain, 0, unroll=True)


# ----------------------------------------------------------------------------
# Wrappers.
# ----------------------------------------------------------------------------
def _choose_bt(batch, per_elem_block_bytes, *, max_bt=8):
    # Group several batch elements per grid step (amortizes the ~0.35us
    # per-step overhead), while (a) keeping >= 2 grid steps so both v7x
    # TensorCores get balanced work, (b) dividing the batch evenly, and
    # (c) fitting the double-buffered blocks in the scoped-VMEM budget.
    bt = max(1, min(max_bt, batch // 2))
    while bt > 1 and (batch % bt != 0
                      or 2 * bt * per_elem_block_bytes > _BLOCK_BUDGET_BYTES):
        bt -= 1
    return bt


def _slab_gather(x, keep_idx_flat, *, num_keep):
    B, N, D = x.shape
    itemsize = jnp.dtype(x.dtype).itemsize
    bt = _choose_bt(B, (N + num_keep) * D * itemsize)
    kernel = functools.partial(_slab_gather_kernel, bt=bt, num_keep=num_keep)
    return pl.pallas_call(
        kernel,
        out_shape=jax.ShapeDtypeStruct((B, num_keep, D), x.dtype),
        grid_spec=pltpu.PrefetchScalarGridSpec(
            num_scalar_prefetch=1,
            grid=(B // bt,),
            in_specs=[pl.BlockSpec((bt, N, D), lambda g, idx: (g, 0, 0))],
            out_specs=pl.BlockSpec((bt, num_keep, D), lambda g, idx: (g, 0, 0)),
        ),
        compiler_params=pltpu.CompilerParams(
            dimension_semantics=("parallel",),
            vmem_limit_bytes=_VMEM_LIMIT_BYTES,
        ),
    )(keep_idx_flat, x)


def _dma_gather(x, keep_idx_flat, *, num_keep):
    B, N, D = x.shape
    itemsize = jnp.dtype(x.dtype).itemsize
    bt = _choose_bt(B, num_keep * D * itemsize)   # only the output block is in VMEM
    kernel = functools.partial(_dma_gather_kernel, bt=bt, num_keep=num_keep)
    return pl.pallas_call(
        kernel,
        out_shape=jax.ShapeDtypeStruct((B, num_keep, D), x.dtype),
        grid_spec=pltpu.PrefetchScalarGridSpec(
            num_scalar_prefetch=1,
            grid=(B // bt,),
            in_specs=[pl.BlockSpec(memory_space=pl.ANY)],     # x stays in HBM
            out_specs=pl.BlockSpec((bt, num_keep, D), lambda g, idx: (g, 0, 0)),
            scratch_shapes=[pltpu.SemaphoreType.DMA((_DMA_DEPTH,))],
        ),
        compiler_params=pltpu.CompilerParams(
            dimension_semantics=("parallel",),
            vmem_limit_bytes=_VMEM_LIMIT_BYTES,
        ),
    )(keep_idx_flat, x)


@functools.partial(jax.jit, static_argnames=("num_keep", "use_slab"))
def _patch_dropout_train(x, key, *, num_keep, use_slab):
    b, n, _ = x.shape
    # torch.randn(b, n).topk(num_keep, dim=-1).indices equivalent (descending
    # score order). top_k / RNG score generation has no clean in-kernel Pallas
    # equivalent; it is cheap JAX glue fused into this single jit.
    scores = jax.random.normal(key, (b, n), dtype=jnp.float32)
    _, keep_idx = lax.top_k(scores, num_keep)
    # Flatten to 1-D so the SMEM prefetch is not padded to
    # [ceil(B/8)*8, ceil(K/128)*128]. For very large B*K (~>100K entries),
    # chunk the batch across pallas_call invocations to keep SMEM small.
    keep_idx_flat = keep_idx.astype(jnp.int32).reshape(-1)
    if use_slab:
        return _slab_gather(x, keep_idx_flat, num_keep=num_keep)
    return _dma_gather(x, keep_idx_flat, num_keep=num_keep)


class PatchDropout:
    """JAX/Pallas port of the PyTorch PatchDropout module."""

    def __init__(self, prob):
        assert 0 <= prob < 1.0
        self.prob = prob
        self.training = True  # mimic nn.Module training flag

    def __call__(self, x, key, force_keep_all=False):
        if (not self.training) or self.prob == 0.0 or force_keep_all:
            return x
        _, n, _ = x.shape
        num_keep = max(1, int(n * (1 - self.prob)))
        # Full-slab in-VMEM selection wins whenever >~25% of rows are kept
        # (one large sequential DMA at full HBM bandwidth); the per-row HBM
        # DMA gather only pays off for very aggressive dropout.
        use_slab = (num_keep / n) >= _SLAB_KEEP_RATIO_THRESHOLD
        # Note: for bf16/fp8 inputs on the row-DMA path, pack pairs/quads into
        # uint32 along D in this wrapper to widen the strided row reads; the
        # slab path reads full tiles and needs no packing.
        return _patch_dropout_train(x, key, num_keep=num_keep, use_slab=use_slab)


if __name__ == "__main__":
    key = jax.random.PRNGKey(0)
    kx, kdrop = jax.random.split(key)

    B, N, D = 2, 8, 128
    x = jax.random.normal(kx, (B, N, D), dtype=jnp.float32)

    def reference(x, key, prob):
        b, n, _ = x.shape
        num_keep = max(1, int(n * (1 - prob)))
        scores = jax.random.normal(key, (b, n), dtype=jnp.float32)
        _, keep_idx = lax.top_k(scores, num_keep)
        return x[jnp.arange(b)[:, None], keep_idx], num_keep

    # Moderate dropout -> full-slab in-VMEM gather path.
    mod = PatchDropout(0.5)
    out = jax.block_until_ready(mod(x, kdrop))
    ref, num_keep = reference(x, kdrop, 0.5)
    assert out.shape == (B, num_keep, D), out.shape
    assert jnp.array_equal(out, ref), "slab-gather mismatch vs reference"

    # Aggressive dropout -> HBM row-DMA gather path.
    mod_hi = PatchDropout(0.875)
    out_hi = jax.block_until_ready(mod_hi(x, kdrop))
    ref_hi, num_keep_hi = reference(x, kdrop, 0.875)
    assert out_hi.shape == (B, num_keep_hi, D), out_hi.shape
    assert jnp.array_equal(out_hi, ref_hi), "dma-gather mismatch vs reference"

    # Identity paths (eval / force_keep_all) — no kernel needed.
    mod.training = False
    assert jnp.array_equal(mod(x, kdrop), x)
    mod.training = True
    assert jnp.array_equal(mod(x, kdrop, force_keep_all=True), x)

    print("KERNEL_OK")
</pallas_src>

<mosaic_0001>
module attributes {stable_mosaic.version = 11 : i64} {
  func.func @_slab_gather_kernel(%arg0: i32, %arg1: memref<8xi32, #tpu.memory_space<smem>>, %arg2: memref<1x8x128xf32, #tpu.memory_space<vmem>>, %arg3: memref<1x4x128xf32, #tpu.memory_space<vmem>>) attributes {dimension_semantics = [#tpu.dimension_semantics<parallel>], iteration_bounds = array<i64: 2>, scalar_prefetch = 1 : i64, scratch_operands = 0 : i64, tpu.core_type = #tpu.core_type<tc>, window_params = [{transform_indices = @transform_0, window_bounds = array<i64: 1, 8, 128>}, {transform_indices = @transform_1, window_bounds = array<i64: 1, 4, 128>}]} {
    %c1_i32 = arith.constant 1 : i32
    %0 = arith.muli %arg0, %c1_i32 : i32
    %c4_i32 = arith.constant 4 : i32
    %1 = arith.muli %0, %c4_i32 : i32
    %c0_i32 = arith.constant 0 : i32
    %c0_i32_0 = arith.constant 0 : i32
    %2 = arith.addi %1, %c0_i32_0 : i32
    %3 = arith.addi %2, %c0_i32 : i32
    %4 = arith.index_cast %3 : i32 to index
    %5 = memref.load %arg1[%4] : memref<8xi32, #tpu.memory_space<smem>>
    %c0 = arith.constant 0 : index
    %6 = arith.index_cast %5 : i32 to index
    %c0_1 = arith.constant 0 : index
    %7 = vector.load %arg2[%c0, %6, %c0_1] : memref<1x8x128xf32, #tpu.memory_space<vmem>>, vector<1x1x128xf32>
    %8 = vector.shape_cast %7 : vector<1x1x128xf32> to vector<1x128xf32>
    %c0_2 = arith.constant 0 : index
    %9 = arith.index_cast %c0_i32 : i32 to index
    %c0_3 = arith.constant 0 : index
    %10 = vector.load %arg3[%c0_2, %9, %c0_3] : memref<1x4x128xf32, #tpu.memory_space<vmem>>, vector<1x1x128xf32>
    %11 = vector.shape_cast %10 : vector<1x1x128xf32> to vector<1x128xf32>
    %12 = vector.shape_cast %8 : vector<1x128xf32> to vector<1x1x128xf32>
    tpu.vector_store %arg3[%c0_2, %9, %c0_3], %12 {strides = array<i32>} : memref<1x4x128xf32, #tpu.memory_space<vmem>>, vector<1x1x128xf32>,
    %c1_i32_4 = arith.constant 1 : i32
    %c0_i32_5 = arith.constant 0 : i32
    %13 = arith.addi %1, %c0_i32_5 : i32
    %14 = arith.addi %13, %c1_i32_4 : i32
    %15 = arith.index_cast %14 : i32 to index
    %16 = memref.load %arg1[%15] : memref<8xi32, #tpu.memory_space<smem>>
    %c0_6 = arith.constant 0 : index
    %17 = arith.index_cast %16 : i32 to index
    %c0_7 = arith.constant 0 : index
    %18 = vector.load %arg2[%c0_6, %17, %c0_7] : memref<1x8x128xf32, #tpu.memory_space<vmem>>, vector<1x1x128xf32>
    %19 = vector.shape_cast %18 : vector<1x1x128xf32> to vector<1x128xf32>
    %c0_8 = arith.constant 0 : index
    %20 = arith.index_cast %c1_i32_4 : i32 to index
    %c0_9 = arith.constant 0 : index
    %21 = vector.load %arg3[%c0_8, %20, %c0_9] : memref<1x4x128xf32, #tpu.memory_space<vmem>>, vector<1x1x128xf32>
    %22 = vector.shape_cast %21 : vector<1x1x128xf32> to vector<1x128xf32>
    %23 = vector.shape_cast %19 : vector<1x128xf32> to vector<1x1x128xf32>
    tpu.vector_store %arg3[%c0_8, %20, %c0_9], %23 {strides = array<i32>} : memref<1x4x128xf32, #tpu.memory_space<vmem>>, vector<1x1x128xf32>,
    %c2_i32 = arith.constant 2 : i32
    %c0_i32_10 = arith.constant 0 : i32
    %24 = arith.addi %1, %c0_i32_10 : i32
    %25 = arith.addi %24, %c2_i32 : i32
    %26 = arith.index_cast %25 : i32 to index
    %27 = memref.load %arg1[%26] : memref<8xi32, #tpu.memory_space<smem>>
    %c0_11 = arith.constant 0 : index
    %28 = arith.index_cast %27 : i32 to index
    %c0_12 = arith.constant 0 : index
    %29 = vector.load %arg2[%c0_11, %28, %c0_12] : memref<1x8x128xf32, #tpu.memory_space<vmem>>, vector<1x1x128xf32>
    %30 = vector.shape_cast %29 : vector<1x1x128xf32> to vector<1x128xf32>
    %c0_13 = arith.constant 0 : index
    %31 = arith.index_cast %c2_i32 : i32 to index
    %c0_14 = arith.constant 0 : index
    %32 = vector.load %arg3[%c0_13, %31, %c0_14] : memref<1x4x128xf32, #tpu.memory_space<vmem>>, vector<1x1x128xf32>
    %33 = vector.shape_cast %32 : vector<1x1x128xf32> to vector<1x128xf32>
    %34 = vector.shape_cast %30 : vector<1x128xf32> to vector<1x1x128xf32>
    tpu.vector_store %arg3[%c0_13, %31, %c0_14], %34 {strides = array<i32>} : memref<1x4x128xf32, #tpu.memory_space<vmem>>, vector<1x1x128xf32>,
    %c3_i32 = arith.constant 3 : i32
    %c0_i32_15 = arith.constant 0 : i32
    %35 = arith.addi %1, %c0_i32_15 : i32
    %36 = arith.addi %35, %c3_i32 : i32
    %37 = arith.index_cast %36 : i32 to index
    %38 = memref.load %arg1[%37] : memref<8xi32, #tpu.memory_space<smem>>
    %c0_16 = arith.constant 0 : index
    %39 = arith.index_cast %38 : i32 to index
    %c0_17 = arith.constant 0 : index
    %40 = vector.load %arg2[%c0_16, %39, %c0_17] : memref<1x8x128xf32, #tpu.memory_space<vmem>>, vector<1x1x128xf32>
    %41 = vector.shape_cast %40 : vector<1x1x128xf32> to vector<1x128xf32>
    %c0_18 = arith.constant 0 : index
    %42 = arith.index_cast %c3_i32 : i32 to index
    %c0_19 = arith.constant 0 : index
    %43 = vector.load %arg3[%c0_18, %42, %c0_19] : memref<1x4x128xf32, #tpu.memory_space<vmem>>, vector<1x1x128xf32>
    %44 = vector.shape_cast %43 : vector<1x1x128xf32> to vector<1x128xf32>
    %45 = vector.shape_cast %41 : vector<1x128xf32> to vector<1x1x128xf32>
    tpu.vector_store %arg3[%c0_18, %42, %c0_19], %45 {strides = array<i32>} : memref<1x4x128xf32, #tpu.memory_space<vmem>>, vector<1x1x128xf32>,
    %c4_i32_20 = arith.constant 4 : i32
    return
  }
  func.func @transform_0(%arg0: i32, %arg1: memref<8xi32, #tpu.memory_space<smem>>) -> (i32, i32, i32) {
    %c0_i32 = arith.constant 0 : i32
    %c0_i32_0 = arith.constant 0 : i32
    %c0_i32_1 = arith.constant 0 : i32
    return %arg0, %c0_i32, %c0_i32_0 : i32, i32, i32
  }
  func.func @transform_1(%arg0: i32, %arg1: memref<8xi32, #tpu.memory_space<smem>>) -> (i32, i32, i32) {
    %c0_i32 = arith.constant 0 : i32
    %c0_i32_0 = arith.constant 0 : i32
    %c0_i32_1 = arith.constant 0 : i32
    return %arg0, %c0_i32, %c0_i32_0 : i32, i32, i32
  }
}

</mosaic_0001>

<bundles_post_ra>
// kernel: _patch_dropout_train.1
= control target key start
LH: loop header
LB: loop body
LE: loop exit
PB: predicated region body
PF: predicated region fallthrough
CT: control target
= control target key end

     0   :  { %s467_s0 = inlined_call_operand.vmem [shape: s32[8], index: 0, kind: input, shape index: {}]   ;;  %s468_s1 = inlined_call_operand.vmem [shape: f32[2,8,128], index: 1, kind: input, shape index: {}]   ;;  %s469_s2 = inlined_call_operand.hbm [shape: f32[2,4,128], index: 2, kind: output, shape index: {}]  }
   0x1   :  { %s7_s11 = sshll.u32 %s467_s0, 4  ;;  %s8_s11 = int_to_ptr.vmem [resolvable:$true] %s7_s11 }
   0x2   :  { %s267_s12 = scalar_lea.vmem %s8_s11, 16  ;;  %p272_p1 = scmp.lt.s32.totalorder %s8_s11, %s8_s11 }
   0x3   :  { %p268_p0 = scmp.ne.s32.totalorder %s8_s11, %s267_s12  ;;  %p273_p2 = scmp.lt.s32.totalorder %s267_s12, %s267_s12 }
   0x5   :  { %p274_p3 = por %p273_p2, %p272_p1 }
   0x7   :  { %p275_p4 = pnand %p274_p3, %p268_p0 }
   0x9   :  { %278 = shalt.err (!%p275_p4)  }
   0xa   :  { %s343_s13 = smov [#allocation3]  }
   0xb   :  { %10 = dma.vmem_to_smem %s8_s11, 16, %s343_s13, [#allocation2] }
   0xc   :  { %321 = dma.done.wait [#allocation2], 16 }
   0xd   :  { %322 = vsyncadd [#allocation2], 4294967280 }
   0xe   :  { %12 = sfence }
   0xf   :  { %13 = vsyncpa [#allocation5], 0 }
  0x10   :  { %15 = vsyncpa [#allocation5 + $0x1], 0  ;;  %s363_s14 = smov 0   ;;  %s365_s15 = smov 0  }
  0x11   :  { %s367_s0 = smov 0   ;;  %s369_s16 = smov 0  }
  0x12 LB: > { %s384_s17 = sadd.s32 4294967295, %s341_s16   ;;  %s216_s18 = sadd.s32 4294967294, %s341_s16   ;;  %s341_s16 = sphi %s369_s16, %s477_s16   ;;  %s337_s0 = sphi %s367_s0, %s476_s0   ;;  %s333_s15 = sphi %s365_s15, %s475_s15   ;;  %s329_s14 = sphi %s363_s14, %s474_s14  }
  0x13   : > { %s388_s19 = sadd.s32 1, %s341_s16   ;;  %s54_s20 = sadd.s32 1, %s337_s0 }
  0x14   : > { %s51_s21 = ssub.s32 %s341_s16, %s388_s19  ;;  %p64_p5 = scmp.ne.s32.totalorder %s337_s0, %s333_s15 }
  0x15   : > { %p52_p6 = scmp.eq.s32.totalorder %s51_s21, 0  ;;  %p65_p7 = scmp.eq.s32.totalorder %s384_s17, 1 }
  0x16   : > { %p70_p8 = scmp.ne.s32.totalorder %s333_s15, %s329_s14  ;;  %p71_p9 = scmp.eq.s32.totalorder %s216_s18, 1 }
  0x17   : > { %s399_s22 = scalar_select %p52_p6, %s337_s0, %s54_s20  }
  0x18   : > { %p401_p10 = por %p65_p7, %p64_p5  ;;  %p405_p11 = por %p71_p9, %p70_p8 }
  0x19   : > { %p219_p12 = scmp.ge.s32.totalorder %s341_s16, 1  ;;  %p96_p13 = scmp.lt.s32.totalorder %s341_s16, 3 }
  0x1b   : > { %p97_p0 = pnand %p219_p12, %p96_p13 }
  0x1c   : > { %s470_s25 = sand.u32 (!%p97_p0), 1, %s333_s15   ;;  %p115_p1 = scmp.lt.s32.totalorder (!%p97_p0), %s384_s17, 1 }
  0x1d   : > { %100 = sbr.rel (%p97_p0) target bundleno = 63 (0x3f), region = 24  ;;  %s220_s26 = sshll.u32 (!%p97_p0), %s470_s25, 2 }
  0x1e   : > { %s222_s27 = sshll.u32 (!%p97_p0), %s384_s17, 2  ;;  %s114_s13 = scalar_lea.vmem (!%p97_p0), [#allocation4], %s220_s26 }
  0x1f   : > { %s120_s28 = sld [smem:[#allocation3 + %s222_s27]] (!%p97_p0)  ;;  %s124_s30 = sadd.s32 (!%p97_p0), 1, %s222_s27 }
  0x20   : > { %s125_s4 = sld [smem:[#allocation3 + %s124_s30]] (!%p97_p0)  ;;  %s129_s8 = sadd.s32 (!%p97_p0), 2, %s222_s27 }
  0x21   : > { %s130_s9 = sld [smem:[#allocation3 + %s129_s8]] (!%p97_p0)  ;;  %s134_s10 = sadd.s32 (!%p97_p0), 3, %s222_s27 }
  0x22   : > { %s116_s29 = scalar_select %p115_p1, %s384_s17, 1 }
  0x23   : > { %s135_s12 = sld [smem:[#allocation3 + %s134_s10]]  ;;  %s224_s18 = sshll.u32 %s384_s17, 6 }
  0x24   : > { %s221_s3 = sshll.u32 %s116_s29, 3  ;;  %s153_s21 = sshll.u32 %s114_s13, 4  ;;  %s426_s21 = int_to_ptr.vmem [resolvable:$true] %s153_s21 }
  0x25   : > { %s118_s7 = scalar_lea.vmem %s468_s1, %s221_s3  ;;  %s424_s3 = scalar_lea.hbm %s469_s2, %s224_s18 }
  0x26   : > { %s121_s11 = scalar_lea.vmem %s118_s7, %s120_s28  ;;  %s126_s20 = scalar_lea.vmem %s118_s7, %s125_s4 }
  0x27   : > { %v122_v0 = vld [vmem:[%s121_s11] sm:$0x1]  ;;  %s131_s29 = scalar_lea.vmem %s118_s7, %s130_s9  ;;  %s473_s17 = sand.u32 1, %s333_s15  }
  0x28   : > { %123 = vst [vmem:[%s114_s13] sm:$0x1] %v122_v0  ;;  %v127_v1 = vld [vmem:[%s126_s20] sm:$0x1]  ;;  %s140_s26 = scalar_lea.sflag [#allocation5], %s473_s17  ;;  %s279_s28 = scalar_lea.vmem %s426_s21, 64 }
  0x29   : > { %128 = vst [vmem:[%s114_s13 + $0x1] sm:$0x1] %v127_v1  ;;  %v132_v2 = vld [vmem:[%s131_s29] sm:$0x1]  ;;  %s136_s27 = scalar_lea.vmem %s118_s7, %s135_s12  ;;  %p280_p2 = scmp.ne.s32.totalorder %s426_s21, %s279_s28 }
  0x2a   : > { %133 = vst [vmem:[%s114_s13 + $0x2] sm:$0x1] %v132_v2  ;;  %v137_v3 = vld [vmem:[%s136_s27] sm:$0x1]  ;;  %s344_s25 = smov [#allocation4]  }
  0x2b   : > { %138 = vst [vmem:[%s114_s13 + $0x3] sm:$0x1] %v137_v3  ;;  %p281_p3 = pnand %p280_p2, %p401_p10  ;;  %s283_s4 = sshll.u32 %s344_s25, 4  ;;  %s284_s4 = int_to_ptr.vmem [resolvable:$false] %s283_s4 }
  0x2c   : > { %s285_s5 = scalar_lea.vmem %s284_s4, 128  ;;  %p286_p5 = scmp.lt.s32.totalorder %s426_s21, %s284_s4 }
  0x2d   : > { %p282_p4 = pneg %p281_p3  ;;  %p287_p6 = scmp.lt.s32.totalorder %s285_s5, %s279_s28 }
  0x2f   : > { %p288_p7 = por %p287_p6, %p286_p5 }
  0x31   : > { %p289_p8 = pnand %p288_p7, %p282_p4 }
  0x33   : > { %292 = shalt.err (!%p289_p8)
}
  0x34   : > { %s293_s6 = scalar_lea.hbm %s424_s3, 64  ;;  %s297_s9 = scalar_lea.hbm %s469_s2, 128 }
  0x35   : > { %p294_p9 = scmp.ne.s32.totalorder %s424_s3, %s293_s6  ;;  %p298_p0 = scmp.lt.s32.totalorder %s424_s3, %s469_s2 }
  0x36   : > { %p299_p1 = scmp.lt.s32.totalorder %s297_s9, %s293_s6 }
  0x37   : > { %p295_p12 = pnand %p294_p9, %p401_p10 }
  0x38   : > { %p300_p2 = por %p299_p1, %p298_p0 }
  0x39   : > { %p296_p13 = pneg %p295_p12 }
  0x3b   : > { %p301_p3 = pnand %p300_p2, %p296_p13 }
  0x3d   : > { %304 = shalt.err (!%p301_p3)
}
  0x3e   : > { %227 = dma.vmem_to_hbm [thread:$0]  (%p401_p10), %s426_s21, 64, %s424_s3, %s140_s26  }
  0x3f PF: > { %p233_p4 = scmp.ge.s32.totalorder %s341_s16, 2  ;;  %s165_s12 = sand.u32 1, %s329_s14  }
  0x40   : > { %s166_s13 = scalar_lea.sflag [#allocation5], %s165_s12 }
  0x41   : > { %p230_p5 = pnand %p233_p4, %p405_p11 }
  0x43   : > { %p231_p6 = pneg %p230_p5 }
  0x45   : > { %324 = dma.done.wait (%p231_p6), %s166_s13, 64  }
  0x46   : > { %326 = vsyncadd (%p231_p6), %s166_s13, 4294967232  ;;  %p18_p7 = scmp.ge.s32.totalorder %s388_s19, 4   ;;  %s474_s14 = smov %s333_s15 }
  0x47   : > { %s475_s15 = smov %s337_s0  ;;  %s476_s0 = smov %s399_s22 }
  0x48   : > { %s477_s16 = smov %s388_s19  ;;  %20 = sbr.rel (!%p18_p7) target bundleno = 18 (0x12), region = 63 }
  0x4d   :  { %171 = vsyncpa [#allocation5], 1 }
  0x4e   :  { %173 = vsyncpa [#allocation5 + $0x1], 1 }

</bundles_post_ra>
